<compile_context>
chip_gen: v5e
topology: v5e:2x2
jax: 0.10.0
libtpu: 0.0.40
codegen_flags: <defaults>
</compile_context>

<pallas_src>
import math

import jax
import jax.numpy as jnp
from jax.experimental import pallas as pl
from jax.experimental.pallas import tpu as pltpu


def _round_up(x, m):
    return ((x + m - 1) // m) * m


# ---------------------------------------------------------------------------
# Fused kernel:  BN -> ReLU -> 2x2 avg-pool (VPU) -> 1x1 conv (MXU).
# Inputs are the four bf16 taps of each pooling window, channels-last,
# flattened over (batch, pooled spatial) into rows.
# ---------------------------------------------------------------------------
def _transition_kernel(scale_ref, shift_ref, w_ref,
                       q00_ref, q01_ref, q10_ref, q11_ref, o_ref):
    scale = scale_ref[...]          # (1, Cin) f32
    shift = shift_ref[...]          # (1, Cin) f32

    # AvgPool2d(2,2)(ReLU(BN(x))) = 0.25 * sum over the 4 window taps of
    # ReLU(BN(tap)); the 0.25 is folded into the conv weight.  Taps are bf16
    # in HBM/VMEM and upcast to f32 here so BN+ReLU run in f32 on the VPU.
    z = jnp.maximum(q00_ref[...].astype(jnp.float32) * scale + shift, 0.0)
    z = z + jnp.maximum(q01_ref[...].astype(jnp.float32) * scale + shift, 0.0)
    z = z + jnp.maximum(q10_ref[...].astype(jnp.float32) * scale + shift, 0.0)
    z = z + jnp.maximum(q11_ref[...].astype(jnp.float32) * scale + shift, 0.0)

    # 1x1 conv after the pool (pool commutes with the channel matmul), so the
    # MXU works on the 4x smaller pooled tile.  bf16 inputs, f32 accumulate.
    y = jnp.dot(z.astype(w_ref.dtype), w_ref[...],
                preferred_element_type=jnp.float32)      # (tile, Cout)
    o_ref[...] = y.astype(o_ref.dtype)


def transition_block(x_nchw, gamma, beta, conv_w, eps=1e-5,
                     *, spatial_tile=512, mxu_dtype=jnp.bfloat16):
    """Forward pass of TransitionBlock (training-mode BN semantics).

    x_nchw : (N, Cin, H, W) float32   (H, W even, as in DenseNet)
    gamma, beta : (Cin,) BatchNorm affine params
    conv_w : (Cout, Cin) or (Cout, Cin, 1, 1) 1x1-conv weight (bias=False)
    returns (N, Cout, H//2, W//2) float32
    """
    N, Cin, H, W = x_nchw.shape
    Cout = conv_w.shape[0]
    # TODO(synk): odd H/W (AvgPool2d floor semantics) not handled; DenseNet
    # transition inputs are always even.
    assert H % 2 == 0 and W % 2 == 0, "TransitionBlock expects even H, W"
    Hp, Wp = H // 2, W // 2
    HpWp = Hp * Wp

    # --- row tiling of the flattened (batch * pooled-spatial) axis ----------
    # Tile is a multiple of 256 (full MXU M-passes, large DMA blocks); per-image
    # padding is the smallest amount that makes N * hpwp_pad divisible by tile.
    tile = min(_round_up(spatial_tile, 256), _round_up(N * HpWp, 256))
    step = tile // math.gcd(N, tile)
    hpwp_pad = _round_up(HpWp, step)
    pad = hpwp_pad - HpWp
    M = N * hpwp_pad                     # divisible by tile by construction

    # --- BatchNorm batch statistics: f32-exact, straight from x_nchw --------
    # (plain XLA reduction; reads x in its native layout, no padded rows).
    xf = x_nchw.astype(jnp.float32)
    count = float(N * H * W)
    mean = jnp.sum(xf, axis=(0, 2, 3)) / count                    # (Cin,)
    sumsq = jnp.sum(xf * xf, axis=(0, 2, 3))
    var = jnp.maximum(sumsq / count - mean * mean, 0.0)           # biased var
    scale = (gamma.astype(jnp.float32) / jnp.sqrt(var + eps))[None, :]
    shift = beta.astype(jnp.float32)[None, :] - mean[None, :] * scale

    # --- pooling-window taps: NCHW -> bf16 channels-last, flattened ---------
    # XLA fuses slice + transpose + pad + convert into a single copy per tap.
    def tap(i, j):
        t = jnp.transpose(x_nchw[:, :, i::2, j::2], (0, 2, 3, 1))  # (N,Hp,Wp,C)
        t = t.reshape(N, HpWp, Cin)
        if pad:
            t = jnp.pad(t, ((0, 0), (0, pad), (0, 0)))
        return t.reshape(M, Cin).astype(mxu_dtype)

    q00, q01, q10, q11 = tap(0, 0), tap(0, 1), tap(1, 0), tap(1, 1)

    # --- conv weight as (Cin, Cout) with the 0.25 pool factor folded in -----
    w_mat = (0.25 * conv_w.reshape(Cout, Cin).astype(jnp.float32)
             ).T.astype(mxu_dtype)

    # --- explicit scoped-VMEM budget (v5e default is only ~16 MiB) ----------
    tap_item = jnp.dtype(mxu_dtype).itemsize
    block_bytes = 2 * (4 * tile * Cin * tap_item       # taps, double-buffered
                       + tile * Cout * 4               # f32 output
                       + Cin * Cout * tap_item         # weight
                       + 2 * Cin * 4)                  # scale + shift
    vmem_limit = int(min(block_bytes + (8 << 20), 64 << 20))

    # --- fused kernel --------------------------------------------------------
    q_spec = pl.BlockSpec((tile, Cin), lambda i: (i, 0))
    vec_spec = pl.BlockSpec((1, Cin), lambda i: (0, 0))
    out_flat = pl.pallas_call(
        _transition_kernel,
        out_shape=jax.ShapeDtypeStruct((M, Cout), jnp.float32),
        grid=(M // tile,),
        in_specs=[
            vec_spec,                                          # scale
            vec_spec,                                          # shift
            pl.BlockSpec((Cin, Cout), lambda i: (0, 0)),       # conv weight
            q_spec, q_spec, q_spec, q_spec,                    # window taps
        ],
        out_specs=pl.BlockSpec((tile, Cout), lambda i: (i, 0)),
        compiler_params=pltpu.CompilerParams(
            dimension_semantics=("parallel",),
            vmem_limit_bytes=vmem_limit),
    )(scale, shift, w_mat, q00, q01, q10, q11)

    # --- glue: flattened rows -> (N, Cout, Hp, Wp) ---------------------------
    out = out_flat.reshape(N, hpwp_pad, Cout)[:, :HpWp, :]
    out = out.reshape(N, Hp, Wp, Cout)
    return jnp.transpose(out, (0, 3, 1, 2))


# ---------------------------------------------------------------------------
# Pure-JAX reference (PyTorch training-mode forward semantics), for checking.
# ---------------------------------------------------------------------------
def _reference(x, gamma, beta, conv_w, eps=1e-5):
    N, Cin, H, W = x.shape
    Cout = conv_w.shape[0]
    mean = jnp.mean(x, axis=(0, 2, 3), keepdims=True)
    var = jnp.mean((x - mean) ** 2, axis=(0, 2, 3), keepdims=True)
    xn = (x - mean) / jnp.sqrt(var + eps)
    y = jnp.maximum(xn * gamma[None, :, None, None] + beta[None, :, None, None], 0.0)
    y = jnp.einsum("oc,nchw->nohw", conv_w.reshape(Cout, Cin), y)
    y = y.reshape(N, Cout, H // 2, 2, W // 2, 2).mean(axis=(3, 5))
    return y


if __name__ == "__main__":
    key = jax.random.PRNGKey(0)
    N, Cin, H, W = 2, 4, 16, 16
    Cout = 2

    kx, kw = jax.random.split(key)
    x = jax.random.normal(kx, (N, Cin, H, W), dtype=jnp.float32)

    # PyTorch default init: BatchNorm2d weight=1, bias=0; Conv2d weight random.
    gamma = jnp.ones((Cin,), dtype=jnp.float32)
    beta = jnp.zeros((Cin,), dtype=jnp.float32)
    conv_w = 0.1 * jax.random.normal(kw, (Cout, Cin), dtype=jnp.float32)

    out = transition_block(x, gamma, beta, conv_w)
    jax.block_until_ready(out)
    assert out.shape == (N, Cout, H // 2, W // 2), out.shape

    ref = _reference(x, gamma, beta, conv_w)
    max_err = float(jnp.max(jnp.abs(out - ref)))
    # Accuracy contract: taps and MXU operands are bf16 (f32 accumulate).
    assert jnp.allclose(out, ref, rtol=2e-2, atol=2e-2), f"max_err={max_err}"
    print("KERNEL_OK")
</pallas_src>

<mosaic_0001>
module attributes {stable_mosaic.version = 11 : i64} {
  func.func @_transition_kernel(%arg0: i32, %arg1: memref<1x4xf32, #tpu.memory_space<vmem>>, %arg2: memref<1x4xf32, #tpu.memory_space<vmem>>, %arg3: memref<4x2xbf16, #tpu.memory_space<vmem>>, %arg4: memref<256x4xbf16, #tpu.memory_space<vmem>>, %arg5: memref<256x4xbf16, #tpu.memory_space<vmem>>, %arg6: memref<256x4xbf16, #tpu.memory_space<vmem>>, %arg7: memref<256x4xbf16, #tpu.memory_space<vmem>>, %arg8: memref<256x2xf32, #tpu.memory_space<vmem>>) attributes {dimension_semantics = [#tpu.dimension_semantics<parallel>], iteration_bounds = array<i64: 1>, scalar_prefetch = 0 : i64, scratch_operands = 0 : i64, tpu.core_type = #tpu.core_type<tc>, window_params = [{pipeline_mode = #tpu.pipeline_mode<synchronous>, transform_indices = @transform_0, window_bounds = array<i64: 1, 4>}, {pipeline_mode = #tpu.pipeline_mode<synchronous>, transform_indices = @transform_1, window_bounds = array<i64: 1, 4>}, {pipeline_mode = #tpu.pipeline_mode<synchronous>, transform_indices = @transform_2, window_bounds = array<i64: 4, 2>}, {transform_indices = @transform_3, window_bounds = array<i64: 256, 4>}, {transform_indices = @transform_4, window_bounds = array<i64: 256, 4>}, {transform_indices = @transform_5, window_bounds = array<i64: 256, 4>}, {transform_indices = @transform_6, window_bounds = array<i64: 256, 4>}, {transform_indices = @transform_7, window_bounds = array<i64: 256, 2>}]} {
    %c0 = arith.constant 0 : index
    %c0_0 = arith.constant 0 : index
    %0 = vector.load %arg1[%c0, %c0_0] : memref<1x4xf32, #tpu.memory_space<vmem>>, vector<1x4xf32>
    %c0_1 = arith.constant 0 : index
    %c0_2 = arith.constant 0 : index
    %1 = vector.load %arg2[%c0_1, %c0_2] : memref<1x4xf32, #tpu.memory_space<vmem>>, vector<1x4xf32>
    %c0_3 = arith.constant 0 : index
    %c0_4 = arith.constant 0 : index
    %2 = vector.load %arg4[%c0_3, %c0_4] : memref<256x4xbf16, #tpu.memory_space<vmem>>, vector<256x4xbf16>
    %3 = arith.extf %2 : vector<256x4xbf16> to vector<256x4xf32>
    %4 = vector.broadcast %0 : vector<1x4xf32> to vector<256x4xf32>
    %5 = arith.mulf %3, %4 : vector<256x4xf32>
    %6 = vector.broadcast %1 : vector<1x4xf32> to vector<256x4xf32>
    %7 = arith.addf %5, %6 : vector<256x4xf32>
    %cst = arith.constant 0.000000e+00 : f32
    %8 = vector.broadcast %cst : f32 to vector<256x4xf32>
    %9 = arith.maximumf %7, %8 : vector<256x4xf32>
    %c0_5 = arith.constant 0 : index
    %c0_6 = arith.constant 0 : index
    %10 = vector.load %arg5[%c0_5, %c0_6] : memref<256x4xbf16, #tpu.memory_space<vmem>>, vector<256x4xbf16>
    %11 = arith.extf %10 : vector<256x4xbf16> to vector<256x4xf32>
    %12 = vector.broadcast %0 : vector<1x4xf32> to vector<256x4xf32>
    %13 = arith.mulf %11, %12 : vector<256x4xf32>
    %14 = vector.broadcast %1 : vector<1x4xf32> to vector<256x4xf32>
    %15 = arith.addf %13, %14 : vector<256x4xf32>
    %cst_7 = arith.constant 0.000000e+00 : f32
    %16 = vector.broadcast %cst_7 : f32 to vector<256x4xf32>
    %17 = arith.maximumf %15, %16 : vector<256x4xf32>
    %18 = arith.addf %9, %17 : vector<256x4xf32>
    %c0_8 = arith.constant 0 : index
    %c0_9 = arith.constant 0 : index
    %19 = vector.load %arg6[%c0_8, %c0_9] : memref<256x4xbf16, #tpu.memory_space<vmem>>, vector<256x4xbf16>
    %20 = arith.extf %19 : vector<256x4xbf16> to vector<256x4xf32>
    %21 = vector.broadcast %0 : vector<1x4xf32> to vector<256x4xf32>
    %22 = arith.mulf %20, %21 : vector<256x4xf32>
    %23 = vector.broadcast %1 : vector<1x4xf32> to vector<256x4xf32>
    %24 = arith.addf %22, %23 : vector<256x4xf32>
    %cst_10 = arith.constant 0.000000e+00 : f32
    %25 = vector.broadcast %cst_10 : f32 to vector<256x4xf32>
    %26 = arith.maximumf %24, %25 : vector<256x4xf32>
    %27 = arith.addf %18, %26 : vector<256x4xf32>
    %c0_11 = arith.constant 0 : index
    %c0_12 = arith.constant 0 : index
    %28 = vector.load %arg7[%c0_11, %c0_12] : memref<256x4xbf16, #tpu.memory_space<vmem>>, vector<256x4xbf16>
    %29 = arith.extf %28 : vector<256x4xbf16> to vector<256x4xf32>
    %30 = vector.broadcast %0 : vector<1x4xf32> to vector<256x4xf32>
    %31 = arith.mulf %29, %30 : vector<256x4xf32>
    %32 = vector.broadcast %1 : vector<1x4xf32> to vector<256x4xf32>
    %33 = arith.addf %31, %32 : vector<256x4xf32>
    %cst_13 = arith.constant 0.000000e+00 : f32
    %34 = vector.broadcast %cst_13 : f32 to vector<256x4xf32>
    %35 = arith.maximumf %33, %34 : vector<256x4xf32>
    %36 = arith.addf %27, %35 : vector<256x4xf32>
    %37 = arith.truncf %36 : vector<256x4xf32> to vector<256x4xbf16>
    %c0_14 = arith.constant 0 : index
    %c0_15 = arith.constant 0 : index
    %38 = vector.load %arg3[%c0_14, %c0_15] : memref<4x2xbf16, #tpu.memory_space<vmem>>, vector<4x2xbf16>
    %cst_16 = arith.constant dense<0.000000e+00> : vector<256x2xf32>
    %39 = tpu.matmul %37, %38, %cst_16 {dimension_numbers = #tpu.dot_dimension_numbers<[1], [0], [0], [1], [0, 0, 1, 1], [], []>} : vector<256x4xbf16>, vector<4x2xbf16>, vector<256x2xf32> -> vector<256x2xf32>
    %c0_17 = arith.constant 0 : index
    %c0_18 = arith.constant 0 : index
    %40 = vector.load %arg8[%c0_17, %c0_18] : memref<256x2xf32, #tpu.memory_space<vmem>>, vector<256x2xf32>
    tpu.vector_store %arg8[%c0_17, %c0_18], %39 {strides = array<i32>} : memref<256x2xf32, #tpu.memory_space<vmem>>, vector<256x2xf32>,
    return
  }
  func.func @transform_0(%arg0: i32) -> (i32, i32) {
    %c0_i32 = arith.constant 0 : i32
    %c0_i32_0 = arith.constant 0 : i32
    %c0_i32_1 = arith.constant 0 : i32
    return %c0_i32, %c0_i32_0 : i32, i32
  }
  func.func @transform_1(%arg0: i32) -> (i32, i32) {
    %c0_i32 = arith.constant 0 : i32
    %c0_i32_0 = arith.constant 0 : i32
    %c0_i32_1 = arith.constant 0 : i32
    return %c0_i32, %c0_i32_0 : i32, i32
  }
  func.func @transform_2(%arg0: i32) -> (i32, i32) {
    %c0_i32 = arith.constant 0 : i32
    %c0_i32_0 = arith.constant 0 : i32
    %c0_i32_1 = arith.constant 0 : i32
    return %c0_i32, %c0_i32_0 : i32, i32
  }
  func.func @transform_3(%arg0: i32) -> (i32, i32) {
    %c0_i32 = arith.constant 0 : i32
    %c0_i32_0 = arith.constant 0 : i32
    return %arg0, %c0_i32 : i32, i32
  }
  func.func @transform_4(%arg0: i32) -> (i32, i32) {
    %c0_i32 = arith.constant 0 : i32
    %c0_i32_0 = arith.constant 0 : i32
    return %arg0, %c0_i32 : i32, i32
  }
  func.func @transform_5(%arg0: i32) -> (i32, i32) {
    %c0_i32 = arith.constant 0 : i32
    %c0_i32_0 = arith.constant 0 : i32
    return %arg0, %c0_i32 : i32, i32
  }
  func.func @transform_6(%arg0: i32) -> (i32, i32) {
    %c0_i32 = arith.constant 0 : i32
    %c0_i32_0 = arith.constant 0 : i32
    return %arg0, %c0_i32 : i32, i32
  }
  func.func @transform_7(%arg0: i32) -> (i32, i32) {
    %c0_i32 = arith.constant 0 : i32
    %c0_i32_0 = arith.constant 0 : i32
    return %arg0, %c0_i32 : i32, i32
  }
}

</mosaic_0001>

<bundles_post_ra>
// kernel: tpu_custom_call.1
= control target key start
LH: loop header
LB: loop body
LE: loop exit
PB: predicated region body
PF: predicated region fallthrough
CT: control target
= control target key end

     0   :  { %vm837_vm0 = vcmask 1041408   ;;  %vm788_vm1 = vcmask 31744   ;;  %vm930_vm2 = vcmask 15360   ;;  %s1961_s2 = inlined_call_operand.vmem [shape: bf16[4,2], index: 2, kind: input, shape index: {}]   ;;  %s1962_s0 = inlined_call_operand.vmem [shape: f32[1,4], index: 0, kind: input, shape index: {}]   ;;  %s1963_s1 = inlined_call_operand.vmem [shape: f32[1,4], index: 1, kind: input, shape index: {}]   ;;  %s1964_s3 = inlined_call_operand.vmem [shape: bf16[256,4], index: 3, kind: input, shape index: {}]   ;;  %s1965_s4 = inlined_call_operand.vmem [shape: bf16[256,4], index: 4, kind: input, shape index: {}]   ;;  %s1966_s5 = inlined_call_operand.vmem [shape: bf16[256,4], index: 5, kind: input, shape index: {}]   ;;  %s1967_s6 = inlined_call_operand.vmem [shape: bf16[256,4], index: 6, kind: input, shape index: {}]   ;;  %s1968_s7 = inlined_call_operand.vmem [shape: f32[256,2], index: 7, kind: output, shape index: {}]  }
   0x1   :  { %v787_v0 = vld [vmem:[%s1961_s2] sm:$0x3] }
   0x2   :  { %v839_v1 = vsel %vm837_vm0, %v787_v0, 0  ;;  %v984_v2 = vld [vmem:[%s1964_s3] sm:$0xff]  }
   0x3   :  { %v1355_v3 = vld [vmem:[%s1962_s0] ss:$0 sm:$0xff]  ;;  %848 = vmatpush.bf16.msra.mxu0 %v839_v1  ;;  %1299 = vmatpush.bf16.msra.mxu1 %v839_v1  ;;  %v985_v5 = vunpack.c.l.bf16 %v984_v2  ;;  %v986_v6 = vunpack.c.h.bf16 %v984_v2 }
   0x4   :  { %v1360_v4 = vld [vmem:[%s1963_s1] ss:$0 sm:$0xff]  ;;  %1300 = vmatpush.bf16.msra.mxu2 %v839_v1  ;;  %1301 = vmatpush.bf16.msra.mxu3 %v839_v1 }
   0x5   :  { %v1048_v7 = vld [vmem:[%s1965_s4] sm:$0xff]   ;;  %v96_v14 = vmul.f32 %v1355_v3, %v985_v5  ;;  %v97_v15 = vmul.f32 %v1355_v3, %v986_v6 }
   0x6   :  { %v1112_v8 = vld [vmem:[%s1966_s5] sm:$0xff]   ;;  %v1049_v10 = vunpack.c.l.bf16 %v1048_v7  ;;  %v1050_v11 = vunpack.c.h.bf16 %v1048_v7 }
   0x7   :  { %v1176_v9 = vld [vmem:[%s1967_s6] sm:$0xff]   ;;  %v1113_v12 = vunpack.c.l.bf16 %v1112_v8  ;;  %v1114_v13 = vunpack.c.h.bf16 %v1112_v8  ;;  %v131_v22 = vadd.f32 %v1360_v4, %v96_v14  ;;  %v132_v23 = vadd.f32 %v1360_v4, %v97_v15 }
   0x8   :  { %v1177_v16 = vunpack.c.l.bf16 %v1176_v9  ;;  %v1178_v17 = vunpack.c.h.bf16 %v1176_v9  ;;  %v259_v18 = vmul.f32 %v1355_v3, %v1049_v10  ;;  %v260_v19 = vmul.f32 %v1355_v3, %v1050_v11  ;;  %v1242_v30 = vld [vmem:[%s1964_s3 + $0x20] sm:$0xff]  }
   0x9   :  { %v451_v20 = vmul.f32 %v1355_v3, %v1113_v12  ;;  %v452_v21 = vmul.f32 %v1355_v3, %v1114_v13  ;;  %v163_v31 = vmax.f32 %v131_v22, 0.0  ;;  %v164_v32 = vmax.f32 %v132_v23, 0.0  ;;  %v1257_v35 = vld [vmem:[%s1965_s4 + $0x20] sm:$0xff]  }
   0xa   :  { %v643_v24 = vmul.f32 %v1355_v3, %v1177_v16  ;;  %v644_v25 = vmul.f32 %v1355_v3, %v1178_v17  ;;  %v291_v26 = vadd.f32 %v1360_v4, %v259_v18  ;;  %v292_v27 = vadd.f32 %v1360_v4, %v260_v19  ;;  %v1272_v40 = vld [vmem:[%s1966_s5 + $0x20] sm:$0xff]  }
   0xb   :  { %v483_v28 = vadd.f32 %v1360_v4, %v451_v20  ;;  %v484_v29 = vadd.f32 %v1360_v4, %v452_v21  ;;  %v1001_v43 = vunpack.c.l.bf16 %v1242_v30  ;;  %v1002_v44 = vunpack.c.h.bf16 %v1242_v30  ;;  %v1287_v61 = vld [vmem:[%s1967_s6 + $0x20] sm:$0xff]  }
   0xc   :  { %v675_v33 = vadd.f32 %v1360_v4, %v643_v24  ;;  %v676_v34 = vadd.f32 %v1360_v4, %v644_v25  ;;  %v323_v36 = vmax.f32 %v291_v26, 0.0  ;;  %v324_v37 = vmax.f32 %v292_v27, 0.0  ;;  %v1246_v2 = vld [vmem:[%s1964_s3 + $0x40] sm:$0xff]  }
   0xd   :  { %v515_v38 = vmax.f32 %v483_v28, 0.0  ;;  %v516_v39 = vmax.f32 %v484_v29, 0.0  ;;  %v1065_v47 = vunpack.c.l.bf16 %v1257_v35  ;;  %v1066_v48 = vunpack.c.h.bf16 %v1257_v35  ;;  %v1261_v13 = vld [vmem:[%s1965_s4 + $0x40] sm:$0xff]  }
   0xe   :  { %v707_v41 = vmax.f32 %v675_v33, 0.0  ;;  %v708_v42 = vmax.f32 %v676_v34, 0.0  ;;  %v355_v45 = vadd.f32 %v323_v36, %v163_v31  ;;  %v356_v46 = vadd.f32 %v324_v37, %v164_v32  ;;  %v1276_v26 = vld [vmem:[%s1966_s5 + $0x40] sm:$0xff]  }
   0xf   :  { %v104_v49 = vmul.f32 %v1355_v3, %v1001_v43  ;;  %v105_v50 = vmul.f32 %v1355_v3, %v1002_v44  ;;  %v1129_v51 = vunpack.c.l.bf16 %v1272_v40  ;;  %v1130_v52 = vunpack.c.h.bf16 %v1272_v40  ;;  %v1250_v44 = vld [vmem:[%s1964_s3 + $0x60] sm:$0xff]  }
  0x10   :  { %v547_v53 = vadd.f32 %v515_v38, %v355_v45  ;;  %v548_v54 = vadd.f32 %v516_v39, %v356_v46  ;;  %v267_v55 = vmul.f32 %v1355_v3, %v1065_v47  ;;  %v268_v56 = vmul.f32 %v1355_v3, %v1066_v48  ;;  %v1291_v39 = vld [vmem:[%s1967_s6 + $0x40] sm:$0xff]  }
  0x11   :  { %v139_v57 = vadd.f32 %v1360_v4, %v104_v49  ;;  %v140_v58 = vadd.f32 %v1360_v4, %v105_v50  ;;  %v459_v59 = vmul.f32 %v1355_v3, %v1129_v51  ;;  %v460_v60 = vmul.f32 %v1355_v3, %v1130_v52 }
  0x12   :  { %v739_v62 = vadd.f32 %v707_v41, %v547_v53  ;;  %v740_v63 = vadd.f32 %v708_v42, %v548_v54  ;;  %v299_v0 = vadd.f32 %v1360_v4, %v267_v55  ;;  %v300_v1 = vadd.f32 %v1360_v4, %v268_v56 }
  0x13   :  { %v171_v5 = vmax.f32 %v139_v57, 0.0  ;;  %v172_v6 = vmax.f32 %v140_v58, 0.0  ;;  %v491_v7 = vadd.f32 %v1360_v4, %v459_v59  ;;  %v492_v8 = vadd.f32 %v1360_v4, %v460_v60  ;;  %v1265_v57 = vld [vmem:[%s1965_s4 + $0x60] sm:$0xff]  }
  0x14   :  { %v771_v9 = vpack.c.bf16 %v740_v63, %v739_v62  ;;  %v331_v10 = vmax.f32 %v299_v0, 0.0  ;;  %v332_v11 = vmax.f32 %v300_v1, 0.0  ;;  %v1193_v12 = vunpack.c.l.bf16 %v1287_v61 }
  0x15   :  { %v523_v14 = vmax.f32 %v491_v7, 0.0  ;;  %v524_v15 = vmax.f32 %v492_v8, 0.0  ;;  %v1194_v16 = vunpack.c.h.bf16 %v1287_v61  ;;  %v1017_v17 = vunpack.c.l.bf16 %v1246_v2  ;;  %v1280_v8 = vld [vmem:[%s1966_s5 + $0x60] sm:$0xff]  }
  0x16   :  { %967 = vmatmul.msk.bf16.vlgmr.msra.gmra.mxu0 %vm788_vm1, %v771_v9  ;;  %v363_v18 = vadd.f32 %v331_v10, %v171_v5  ;;  %v364_v19 = vadd.f32 %v332_v11, %v172_v6  ;;  %v651_v20 = vmul.f32 %v1355_v3, %v1193_v12  ;;  %v1018_v21 = vunpack.c.h.bf16 %v1246_v2 }
  0x17   :  { %v652_v22 = vmul.f32 %v1355_v3, %v1194_v16  ;;  %v112_v23 = vmul.f32 %v1355_v3, %v1017_v17  ;;  %v1081_v24 = vunpack.c.l.bf16 %v1261_v13  ;;  %v1082_v25 = vunpack.c.h.bf16 %v1261_v13 }
  0x18   :  { %v555_v27 = vadd.f32 %v523_v14, %v363_v18  ;;  %v556_v28 = vadd.f32 %v524_v15, %v364_v19  ;;  %v683_v29 = vadd.f32 %v1360_v4, %v651_v20  ;;  %v113_v30 = vmul.f32 %v1355_v3, %v1018_v21  ;;  %v1295_v21 = vld [vmem:[%s1967_s6 + $0x60] sm:$0xff]  }
  0x19   :  { %v684_v31 = vadd.f32 %v1360_v4, %v652_v22  ;;  %v147_v32 = vadd.f32 %v1360_v4, %v112_v23  ;;  %v275_v33 = vmul.f32 %v1355_v3, %v1081_v24  ;;  %v276_v34 = vmul.f32 %v1355_v3, %v1082_v25 }
  0x1a   :  { %v715_v35 = vmax.f32 %v683_v29, 0.0  ;;  %v148_v36 = vadd.f32 %v1360_v4, %v113_v30  ;;  %v1145_v37 = vunpack.c.l.bf16 %v1276_v26  ;;  %v1146_v38 = vunpack.c.h.bf16 %v1276_v26  ;;  %v1239_v26 = vld [vmem:[%s1964_s3 + $0x8] sm:$0xff]  }
  0x1b   :  { %v716_v40 = vmax.f32 %v684_v31, 0.0  ;;  %v179_v41 = vmax.f32 %v147_v32, 0.0  ;;  %v307_v42 = vadd.f32 %v1360_v4, %v275_v33  ;;  %v308_v43 = vadd.f32 %v1360_v4, %v276_v34 }
  0x1c   :  { %v747_v45 = vadd.f32 %v715_v35, %v555_v27  ;;  %v180_v46 = vmax.f32 %v148_v36, 0.0  ;;  %v467_v47 = vmul.f32 %v1355_v3, %v1145_v37  ;;  %v468_v48 = vmul.f32 %v1355_v3, %v1146_v38 }
  0x1d   :  { %v748_v49 = vadd.f32 %v716_v40, %v556_v28  ;;  %v339_v50 = vmax.f32 %v307_v42, 0.0  ;;  %v340_v51 = vmax.f32 %v308_v43, 0.0  ;;  %v1209_v52 = vunpack.c.l.bf16 %v1291_v39 }
  0x1e   :  { %v499_v53 = vadd.f32 %v1360_v4, %v467_v47  ;;  %v500_v54 = vadd.f32 %v1360_v4, %v468_v48  ;;  %v1210_v55 = vunpack.c.h.bf16 %v1291_v39  ;;  %v1033_v56 = vunpack.c.l.bf16 %v1250_v44  ;;  %v1254_v39 = vld [vmem:[%s1965_s4 + $0x8] sm:$0xff]  }
  0x1f   :  { %v775_v58 = vpack.c.bf16 %v748_v49, %v747_v45  ;;  %v371_v59 = vadd.f32 %v339_v50, %v179_v41  ;;  %v372_v60 = vadd.f32 %v340_v51, %v180_v46  ;;  %v659_v61 = vmul.f32 %v1355_v3, %v1209_v52  ;;  %v1269_v52 = vld [vmem:[%s1966_s5 + $0x8] sm:$0xff]  }
  0x20   :  { %v531_v62 = vmax.f32 %v499_v53, 0.0  ;;  %v532_v63 = vmax.f32 %v500_v54, 0.0  ;;  %v660_v0 = vmul.f32 %v1355_v3, %v1210_v55  ;;  %v1034_v1 = vunpack.c.h.bf16 %v1250_v44 }
  0x21   :  { %971 = vmatmul.msk.bf16.vlgmr.msra.gmra.mxu1 %vm788_vm1, %v775_v58  ;;  %v691_v2 = vadd.f32 %v1360_v4, %v659_v61  ;;  %v120_v5 = vmul.f32 %v1355_v3, %v1033_v56  ;;  %v1097_v6 = vunpack.c.l.bf16 %v1265_v57  ;;  %v1098_v7 = vunpack.c.h.bf16 %v1265_v57  ;;  %v1284_v61 = vld [vmem:[%s1967_s6 + $0x8] sm:$0xff]  }
  0x22   :  { %v563_v9 = vadd.f32 %v531_v62, %v371_v59  ;;  %v564_v10 = vadd.f32 %v532_v63, %v372_v60  ;;  %v692_v11 = vadd.f32 %v1360_v4, %v660_v0  ;;  %v121_v12 = vmul.f32 %v1355_v3, %v1034_v1 }
  0x23   :  { %v723_v13 = vmax.f32 %v691_v2, 0.0  ;;  %v155_v14 = vadd.f32 %v1360_v4, %v120_v5  ;;  %v283_v15 = vmul.f32 %v1355_v3, %v1097_v6  ;;  %v284_v16 = vmul.f32 %v1355_v3, %v1098_v7 }
  0x24   :  { %v724_v17 = vmax.f32 %v692_v11, 0.0  ;;  %v156_v18 = vadd.f32 %v1360_v4, %v121_v12  ;;  %v1161_v19 = vunpack.c.l.bf16 %v1280_v8  ;;  %v1162_v20 = vunpack.c.h.bf16 %v1280_v8  ;;  %v1243_v8 = vld [vmem:[%s1964_s3 + $0x28] sm:$0xff]  }
  0x25   :  { %v755_v22 = vadd.f32 %v723_v13, %v563_v9  ;;  %v187_v23 = vmax.f32 %v155_v14, 0.0  ;;  %v315_v24 = vadd.f32 %v1360_v4, %v283_v15  ;;  %v316_v25 = vadd.f32 %v1360_v4, %v284_v16 }
  0x26   :  { %v756_v27 = vadd.f32 %v724_v17, %v564_v10  ;;  %v188_v28 = vmax.f32 %v156_v18, 0.0  ;;  %v475_v29 = vmul.f32 %v1355_v3, %v1161_v19  ;;  %v476_v30 = vmul.f32 %v1355_v3, %v1162_v20 }
  0x27   :  { %v347_v31 = vmax.f32 %v315_v24, 0.0  ;;  %v348_v32 = vmax.f32 %v316_v25, 0.0  ;;  %v1225_v33 = vunpack.c.l.bf16 %v1295_v21  ;;  %v1226_v34 = vunpack.c.h.bf16 %v1295_v21  ;;  %v1258_v21 = vld [vmem:[%s1965_s4 + $0x28] sm:$0xff]  }
  0x28   :  { %v779_v35 = vpack.c.bf16 %v756_v27, %v755_v22  ;;  %v507_v36 = vadd.f32 %v1360_v4, %v475_v29  ;;  %v508_v37 = vadd.f32 %v1360_v4, %v476_v30  ;;  %v989_v38 = vunpack.c.l.bf16 %v1239_v26 }
  0x29   :  { %v379_v40 = vadd.f32 %v347_v31, %v187_v23  ;;  %v380_v41 = vadd.f32 %v348_v32, %v188_v28  ;;  %v667_v42 = vmul.f32 %v1355_v3, %v1225_v33  ;;  %v668_v43 = vmul.f32 %v1355_v3, %v1226_v34  ;;  %v1273_v34 = vld [vmem:[%s1966_s5 + $0x28] sm:$0xff]  }
  0x2a   :  { %975 = vmatmul.msk.bf16.vlgmr.msra.gmra.mxu2 %vm788_vm1, %v779_v35  ;;  %v539_v44 = vmax.f32 %v507_v36, 0.0  ;;  %v540_v45 = vmax.f32 %v508_v37, 0.0  ;;  %v990_v46 = vunpack.c.h.bf16 %v1239_v26  ;;  %v98_v47 = vmul.f32 %v1355_v3, %v989_v38 }
  0x2b   :  { %v699_v48 = vadd.f32 %v1360_v4, %v667_v42  ;;  %v700_v49 = vadd.f32 %v1360_v4, %v668_v43  ;;  %v1053_v50 = vunpack.c.l.bf16 %v1254_v39  ;;  %v1054_v51 = vunpack.c.h.bf16 %v1254_v39  ;;  %v1288_v43 = vld [vmem:[%s1967_s6 + $0x28] sm:$0xff]  }
  0x2c   :  { %v571_v53 = vadd.f32 %v539_v44, %v379_v40  ;;  %v572_v54 = vadd.f32 %v540_v45, %v380_v41  ;;  %v99_v55 = vmul.f32 %v1355_v3, %v990_v46  ;;  %v133_v56 = vadd.f32 %v1360_v4, %v98_v47 }
  0x2d   :  { %v731_v57 = vmax.f32 %v699_v48, 0.0  ;;  %v732_v58 = vmax.f32 %v700_v49, 0.0  ;;  %v261_v59 = vmul.f32 %v1355_v3, %v1053_v50  ;;  %v262_v60 = vmul.f32 %v1355_v3, %v1054_v51  ;;  %v1247_v48 = vld [vmem:[%s1964_s3 + $0x48] sm:$0xff]  }
  0x2e   :  { %v134_v62 = vadd.f32 %v1360_v4, %v99_v55  ;;  %v165_v63 = vmax.f32 %v133_v56, 0.0  ;;  %v1117_v0 = vunpack.c.l.bf16 %v1269_v52  ;;  %v1118_v1 = vunpack.c.h.bf16 %v1269_v52 }
  0x2f   :  { %v763_v2 = vadd.f32 %v731_v57, %v571_v53  ;;  %v764_v5 = vadd.f32 %v732_v58, %v572_v54  ;;  %v293_v6 = vadd.f32 %v1360_v4, %v261_v59  ;;  %v294_v7 = vadd.f32 %v1360_v4, %v262_v60 }
  0x30   :  { %v166_v9 = vmax.f32 %v134_v62, 0.0  ;;  %v453_v10 = vmul.f32 %v1355_v3, %v1117_v0  ;;  %v454_v11 = vmul.f32 %v1355_v3, %v1118_v1  ;;  %v1181_v12 = vunpack.c.l.bf16 %v1284_v61  ;;  %v1262_v1 = vld [vmem:[%s1965_s4 + $0x48] sm:$0xff]  }
  0x31   :  { %v783_v13 = vpack.c.bf16 %v764_v5, %v763_v2  ;;  %v325_v14 = vmax.f32 %v293_v6, 0.0  ;;  %v326_v15 = vmax.f32 %v294_v7, 0.0  ;;  %v1182_v16 = vunpack.c.h.bf16 %v1284_v61 }
  0x32   :  { %v485_v17 = vadd.f32 %v1360_v4, %v453_v10  ;;  %v486_v18 = vadd.f32 %v1360_v4, %v454_v11  ;;  %v645_v19 = vmul.f32 %v1355_v3, %v1181_v12  ;;  %v1005_v20 = vunpack.c.l.bf16 %v1243_v8 }
  0x33   :  { %979 = vmatmul.msk.bf16.vlgmr.msra.gmra.mxu3 %vm788_vm1, %v783_v13  ;;  %v357_v22 = vadd.f32 %v325_v14, %v165_v63  ;;  %v358_v23 = vadd.f32 %v326_v15, %v166_v9  ;;  %v646_v24 = vmul.f32 %v1355_v3, %v1182_v16  ;;  %v1006_v25 = vunpack.c.h.bf16 %v1243_v8  ;;  %v1277_v16 = vld [vmem:[%s1966_s5 + $0x48] sm:$0xff]  }
  0x34   :  { %v517_v26 = vmax.f32 %v485_v17, 0.0  ;;  %v518_v27 = vmax.f32 %v486_v18, 0.0  ;;  %v677_v28 = vadd.f32 %v1360_v4, %v645_v19  ;;  %v106_v29 = vmul.f32 %v1355_v3, %v1005_v20 }
  0x35   :  { %v678_v30 = vadd.f32 %v1360_v4, %v646_v24  ;;  %v107_v31 = vmul.f32 %v1355_v3, %v1006_v25  ;;  %v1069_v32 = vunpack.c.l.bf16 %v1258_v21  ;;  %v1070_v33 = vunpack.c.h.bf16 %v1258_v21  ;;  %v1292_v21 = vld [vmem:[%s1967_s6 + $0x48] sm:$0xff]  }
  0x36   :  { %v549_v35 = vadd.f32 %v517_v26, %v357_v22  ;;  %v550_v36 = vadd.f32 %v518_v27, %v358_v23  ;;  %v709_v37 = vmax.f32 %v677_v28, 0.0  ;;  %v141_v38 = vadd.f32 %v1360_v4, %v106_v29 }
  0x37   :  { %v710_v39 = vmax.f32 %v678_v30, 0.0  ;;  %v142_v40 = vadd.f32 %v1360_v4, %v107_v31  ;;  %v269_v41 = vmul.f32 %v1355_v3, %v1069_v32  ;;  %v270_v42 = vmul.f32 %v1355_v3, %v1070_v33  ;;  %v1251_v30 = vld [vmem:[%s1964_s3 + $0x68] sm:$0xff]  }
  0x38   :  { %v741_v44 = vadd.f32 %v709_v37, %v549_v35  ;;  %v173_v45 = vmax.f32 %v141_v38, 0.0  ;;  %v1133_v46 = vunpack.c.l.bf16 %v1273_v34  ;;  %v1134_v47 = vunpack.c.h.bf16 %v1273_v34 }
  0x39   :  { %v742_v49 = vadd.f32 %v710_v39, %v550_v36  ;;  %v174_v50 = vmax.f32 %v142_v40, 0.0  ;;  %v301_v51 = vadd.f32 %v1360_v4, %v269_v41  ;;  %v302_v52 = vadd.f32 %v1360_v4, %v270_v42 }
  0x3a   :  { %v461_v53 = vmul.f32 %v1355_v3, %v1133_v46  ;;  %v462_v54 = vmul.f32 %v1355_v3, %v1134_v47  ;;  %v1197_v55 = vunpack.c.l.bf16 %v1288_v43  ;;  %v1198_v56 = vunpack.c.h.bf16 %v1288_v43  ;;  %v1266_v47 = vld [vmem:[%s1965_s4 + $0x68] sm:$0xff]  }
  0x3b   :  { %v772_v57 = vpack.c.bf16 %v742_v49, %v741_v44  ;;  %v333_v58 = vmax.f32 %v301_v51, 0.0  ;;  %v334_v59 = vmax.f32 %v302_v52, 0.0  ;;  %v1021_v60 = vunpack.c.l.bf16 %v1247_v48 }
  0x3c   :  { %v493_v61 = vadd.f32 %v1360_v4, %v461_v53  ;;  %v494_v62 = vadd.f32 %v1360_v4, %v462_v54  ;;  %v653_v63 = vmul.f32 %v1355_v3, %v1197_v55  ;;  %v654_v0 = vmul.f32 %v1355_v3, %v1198_v56  ;;  %v1281_v56 = vld [vmem:[%s1966_s5 + $0x68] sm:$0xff]  }
  0x3d   :  { %968 = vmatmul.msk.bf16.gmra.mxu0 %vm788_vm1, %v772_v57  ;;  %v365_v2 = vadd.f32 %v333_v58, %v173_v45  ;;  %v366_v5 = vadd.f32 %v334_v59, %v174_v50  ;;  %v1022_v6 = vunpack.c.h.bf16 %v1247_v48  ;;  %v114_v7 = vmul.f32 %v1355_v3, %v1021_v60 }
  0x3e   :  { %v525_v8 = vmax.f32 %v493_v61, 0.0  ;;  %v526_v9 = vmax.f32 %v494_v62, 0.0  ;;  %v685_v10 = vadd.f32 %v1360_v4, %v653_v63  ;;  %v686_v11 = vadd.f32 %v1360_v4, %v654_v0 }
  0x3f   :  { %v115_v12 = vmul.f32 %v1355_v3, %v1022_v6  ;;  %v149_v13 = vadd.f32 %v1360_v4, %v114_v7  ;;  %v1085_v14 = vunpack.c.l.bf16 %v1262_v1  ;;  %v1086_v15 = vunpack.c.h.bf16 %v1262_v1  ;;  %v1296_v1 = vld [vmem:[%s1967_s6 + $0x68] sm:$0xff]  }
  0x40   :  { %v557_v17 = vadd.f32 %v525_v8, %v365_v2  ;;  %v558_v18 = vadd.f32 %v526_v9, %v366_v5  ;;  %v717_v19 = vmax.f32 %v685_v10, 0.0  ;;  %v718_v20 = vmax.f32 %v686_v11, 0.0  ;;  %v1240_v8 = vld [vmem:[%s1964_s3 + $0x10] sm:$0xff]  }
  0x41   :  { %v150_v22 = vadd.f32 %v1360_v4, %v115_v12  ;;  %v181_v23 = vmax.f32 %v149_v13, 0.0  ;;  %v277_v24 = vmul.f32 %v1355_v3, %v1085_v14  ;;  %v278_v25 = vmul.f32 %v1355_v3, %v1086_v15 }
  0x42   :  { %v749_v26 = vadd.f32 %v717_v19, %v557_v17  ;;  %v750_v27 = vadd.f32 %v718_v20, %v558_v18  ;;  %v1149_v28 = vunpack.c.l.bf16 %v1277_v16  ;;  %v1150_v29 = vunpack.c.h.bf16 %v1277_v16 }
  0x43   :  { %v182_v31 = vmax.f32 %v150_v22, 0.0  ;;  %v309_v32 = vadd.f32 %v1360_v4, %v277_v24  ;;  %v310_v33 = vadd.f32 %v1360_v4, %v278_v25  ;;  %v1213_v34 = vunpack.c.l.bf16 %v1292_v21 }
  0x44   :  { %v776_v35 = vpack.c.bf16 %v750_v27, %v749_v26  ;;  %v469_v36 = vmul.f32 %v1355_v3, %v1149_v28  ;;  %v470_v37 = vmul.f32 %v1355_v3, %v1150_v29  ;;  %v1214_v38 = vunpack.c.h.bf16 %v1292_v21  ;;  %v1255_v29 = vld [vmem:[%s1965_s4 + $0x10] sm:$0xff]  }
  0x45   :  { %v341_v39 = vmax.f32 %v309_v32, 0.0  ;;  %v342_v40 = vmax.f32 %v310_v33, 0.0  ;;  %v661_v41 = vmul.f32 %v1355_v3, %v1213_v34  ;;  %v1037_v42 = vunpack.c.l.bf16 %v1251_v30 }
  0x46   :  { %972 = vmatmul.msk.bf16.gmra.mxu1 %vm788_vm1, %v776_v35  ;;  %v501_v43 = vadd.f32 %v1360_v4, %v469_v36  ;;  %v502_v44 = vadd.f32 %v1360_v4, %v470_v37  ;;  %v662_v45 = vmul.f32 %v1355_v3, %v1214_v38  ;;  %v1038_v46 = vunpack.c.h.bf16 %v1251_v30  ;;  %v1270_v38 = vld [vmem:[%s1966_s5 + $0x10] sm:$0xff]  }
  0x47   :  { %v373_v48 = vadd.f32 %v341_v39, %v181_v23  ;;  %v374_v49 = vadd.f32 %v342_v40, %v182_v31  ;;  %v693_v50 = vadd.f32 %v1360_v4, %v661_v41  ;;  %v122_v51 = vmul.f32 %v1355_v3, %v1037_v42 }
  0x48   :  { %v533_v52 = vmax.f32 %v501_v43, 0.0  ;;  %v534_v53 = vmax.f32 %v502_v44, 0.0  ;;  %v694_v54 = vadd.f32 %v1360_v4, %v662_v45  ;;  %v123_v55 = vmul.f32 %v1355_v3, %v1038_v46  ;;  %v1285_v43 = vld [vmem:[%s1967_s6 + $0x10] sm:$0xff]  }
  0x49   :  { %v725_v57 = vmax.f32 %v693_v50, 0.0  ;;  %v157_v58 = vadd.f32 %v1360_v4, %v122_v51  ;;  %v1101_v59 = vunpack.c.l.bf16 %v1266_v47  ;;  %v1102_v60 = vunpack.c.h.bf16 %v1266_v47 }
  0x4a   :  { %v565_v61 = vadd.f32 %v533_v52, %v373_v48  ;;  %v566_v62 = vadd.f32 %v534_v53, %v374_v49  ;;  %v726_v63 = vmax.f32 %v694_v54, 0.0  ;;  %v158_v0 = vadd.f32 %v1360_v4, %v123_v55  ;;  %v1244_v52 = vld [vmem:[%s1964_s3 + $0x30] sm:$0xff]  }
  0x4b   :  { %v189_v2 = vmax.f32 %v157_v58, 0.0  ;;  %v285_v5 = vmul.f32 %v1355_v3, %v1101_v59  ;;  %v286_v6 = vmul.f32 %v1355_v3, %v1102_v60  ;;  %v1165_v7 = vunpack.c.l.bf16 %v1281_v56 }
  0x4c   :  { %v757_v9 = vadd.f32 %v725_v57, %v565_v61  ;;  %v758_v10 = vadd.f32 %v726_v63, %v566_v62  ;;  %v190_v11 = vmax.f32 %v158_v0, 0.0  ;;  %v1166_v12 = vunpack.c.h.bf16 %v1281_v56 }
  0x4d   :  { %v317_v13 = vadd.f32 %v1360_v4, %v285_v5  ;;  %v318_v14 = vadd.f32 %v1360_v4, %v286_v6  ;;  %v477_v15 = vmul.f32 %v1355_v3, %v1165_v7  ;;  %v1229_v16 = vunpack.c.l.bf16 %v1296_v1 }
  0x4e   :  { %v780_v17 = vpack.c.bf16 %v758_v10, %v757_v9  ;;  %v478_v18 = vmul.f32 %v1355_v3, %v1166_v12  ;;  %v1230_v19 = vunpack.c.h.bf16 %v1296_v1  ;;  %v993_v20 = vunpack.c.l.bf16 %v1240_v8 }
  0x4f   :  { %v349_v21 = vmax.f32 %v317_v13, 0.0  ;;  %v350_v22 = vmax.f32 %v318_v14, 0.0  ;;  %v509_v23 = vadd.f32 %v1360_v4, %v477_v15  ;;  %v669_v24 = vmul.f32 %v1355_v3, %v1229_v16  ;;  %v1274_v16 = vld [vmem:[%s1966_s5 + $0x30] sm:$0xff]  }
  0x50   :  { %976 = vmatmul.msk.bf16.gmra.mxu2 %vm788_vm1, %v780_v17  ;;  %v510_v25 = vadd.f32 %v1360_v4, %v478_v18  ;;  %v670_v26 = vmul.f32 %v1355_v3, %v1230_v19  ;;  %v994_v27 = vunpack.c.h.bf16 %v1240_v8  ;;  %v100_v28 = vmul.f32 %v1355_v3, %v993_v20 }
  0x51   :  { %v381_v30 = vadd.f32 %v349_v21, %v189_v2  ;;  %v382_v31 = vadd.f32 %v350_v22, %v190_v11  ;;  %v541_v32 = vmax.f32 %v509_v23, 0.0  ;;  %v701_v33 = vadd.f32 %v1360_v4, %v669_v24  ;;  %v1259_v11 = vld [vmem:[%s1965_s4 + $0x30] sm:$0xff]  }
  0x52   :  { %v542_v34 = vmax.f32 %v510_v25, 0.0  ;;  %v702_v35 = vadd.f32 %v1360_v4, %v670_v26  ;;  %v101_v36 = vmul.f32 %v1355_v3, %v994_v27  ;;  %v135_v37 = vadd.f32 %v1360_v4, %v100_v28  ;;  %v1289_v25 = vld [vmem:[%s1967_s6 + $0x30] sm:$0xff]  }
  0x53   :  { %v573_v39 = vadd.f32 %v541_v32, %v381_v30  ;;  %v733_v40 = vmax.f32 %v701_v33, 0.0  ;;  %v1057_v41 = vunpack.c.l.bf16 %v1255_v29  ;;  %v1058_v42 = vunpack.c.h.bf16 %v1255_v29 }
  0x54   :  { %v574_v44 = vadd.f32 %v542_v34, %v382_v31  ;;  %v734_v45 = vmax.f32 %v702_v35, 0.0  ;;  %v136_v46 = vadd.f32 %v1360_v4, %v101_v36  ;;  %v167_v47 = vmax.f32 %v135_v37, 0.0  ;;  %v1248_v34 = vld [vmem:[%s1964_s3 + $0x50] sm:$0xff]  }
  0x55   :  { %v765_v48 = vadd.f32 %v733_v40, %v573_v39  ;;  %v263_v49 = vmul.f32 %v1355_v3, %v1057_v41  ;;  %v264_v50 = vmul.f32 %v1355_v3, %v1058_v42  ;;  %v1121_v51 = vunpack.c.l.bf16 %v1270_v38 }
  0x56   :  { %v766_v53 = vadd.f32 %v734_v45, %v574_v44  ;;  %v168_v54 = vmax.f32 %v136_v46, 0.0  ;;  %v1122_v55 = vunpack.c.h.bf16 %v1270_v38  ;;  %v1185_v56 = vunpack.c.l.bf16 %v1285_v43 }
  0x57   :  { %v295_v57 = vadd.f32 %v1360_v4, %v263_v49  ;;  %v296_v58 = vadd.f32 %v1360_v4, %v264_v50  ;;  %v455_v59 = vmul.f32 %v1355_v3, %v1121_v51  ;;  %v1186_v60 = vunpack.c.h.bf16 %v1285_v43  ;;  %v1263_v51 = vld [vmem:[%s1965_s4 + $0x50] sm:$0xff]  }
  0x58   :  { %v784_v61 = vpack.c.bf16 %v766_v53, %v765_v48  ;;  %v456_v62 = vmul.f32 %v1355_v3, %v1122_v55  ;;  %v647_v63 = vmul.f32 %v1355_v3, %v1185_v56  ;;  %v1009_v0 = vunpack.c.l.bf16 %v1244_v52 }
  0x59   :  { %v327_v1 = vmax.f32 %v295_v57, 0.0  ;;  %v328_v2 = vmax.f32 %v296_v58, 0.0  ;;  %v487_v5 = vadd.f32 %v1360_v4, %v455_v59  ;;  %v648_v6 = vmul.f32 %v1355_v3, %v1186_v60  ;;  %v1278_v60 = vld [vmem:[%s1966_s5 + $0x50] sm:$0xff]  }
  0x5a   :  { %980 = vmatmul.msk.bf16.gmra.mxu3 %vm788_vm1, %v784_v61  ;;  %v488_v7 = vadd.f32 %v1360_v4, %v456_v62  ;;  %v679_v8 = vadd.f32 %v1360_v4, %v647_v63  ;;  %v1010_v9 = vunpack.c.h.bf16 %v1244_v52  ;;  %v108_v10 = vmul.f32 %v1355_v3, %v1009_v0 }
  0x5b   :  { %v359_v12 = vadd.f32 %v327_v1, %v167_v47  ;;  %v360_v13 = vadd.f32 %v328_v2, %v168_v54  ;;  %v519_v14 = vmax.f32 %v487_v5, 0.0  ;;  %v680_v15 = vadd.f32 %v1360_v4, %v648_v6 }
  0x5c   :  { %v520_v17 = vmax.f32 %v488_v7, 0.0  ;;  %v711_v18 = vmax.f32 %v679_v8, 0.0  ;;  %v109_v19 = vmul.f32 %v1355_v3, %v1010_v9  ;;  %v143_v20 = vadd.f32 %v1360_v4, %v108_v10  ;;  %v1293_v7 = vld [vmem:[%s1967_s6 + $0x50] sm:$0xff]  }
  0x5d   :  { %v551_v21 = vadd.f32 %v519_v14, %v359_v12  ;;  %v712_v22 = vmax.f32 %v680_v15, 0.0  ;;  %v1073_v23 = vunpack.c.l.bf16 %v1259_v11  ;;  %v1074_v24 = vunpack.c.h.bf16 %v1259_v11 }
  0x5e   :  { %v552_v26 = vadd.f32 %v520_v17, %v360_v13  ;;  %v144_v27 = vadd.f32 %v1360_v4, %v109_v19  ;;  %v175_v28 = vmax.f32 %v143_v20, 0.0  ;;  %v1137_v29 = vunpack.c.l.bf16 %v1274_v16 }
  0x5f   :  { %v743_v30 = vadd.f32 %v711_v18, %v551_v21  ;;  %v271_v31 = vmul.f32 %v1355_v3, %v1073_v23  ;;  %v272_v32 = vmul.f32 %v1355_v3, %v1074_v24  ;;  %v1138_v33 = vunpack.c.h.bf16 %v1274_v16  ;;  %v1252_v16 = vld [vmem:[%s1964_s3 + $0x70] sm:$0xff]  }
  0x60   :  { %v744_v35 = vadd.f32 %v712_v22, %v552_v26  ;;  %v176_v36 = vmax.f32 %v144_v27, 0.0  ;;  %v463_v37 = vmul.f32 %v1355_v3, %v1137_v29  ;;  %v1201_v38 = vunpack.c.l.bf16 %v1289_v25 }
  0x61   :  { %v303_v39 = vadd.f32 %v1360_v4, %v271_v31  ;;  %v304_v40 = vadd.f32 %v1360_v4, %v272_v32  ;;  %v464_v41 = vmul.f32 %v1355_v3, %v1138_v33  ;;  %v1202_v42 = vunpack.c.h.bf16 %v1289_v25  ;;  %v1267_v33 = vld [vmem:[%s1965_s4 + $0x70] sm:$0xff]  }
  0x62   :  { %v773_v43 = vpack.c.bf16 %v744_v35, %v743_v30  ;;  %v495_v44 = vadd.f32 %v1360_v4, %v463_v37  ;;  %v655_v45 = vmul.f32 %v1355_v3, %v1201_v38  ;;  %v1025_v46 = vunpack.c.l.bf16 %v1248_v34 }
  0x63   :  { %v335_v47 = vmax.f32 %v303_v39, 0.0  ;;  %v336_v48 = vmax.f32 %v304_v40, 0.0  ;;  %v496_v49 = vadd.f32 %v1360_v4, %v464_v41  ;;  %v656_v50 = vmul.f32 %v1355_v3, %v1202_v42  ;;  %v1282_v42 = vld [vmem:[%s1966_s5 + $0x70] sm:$0xff]  }
  0x64   :  { %969 = vmatmul.msk.bf16.gmra.mxu0 %vm788_vm1, %v773_v43  ;;  %v527_v52 = vmax.f32 %v495_v44, 0.0  ;;  %v687_v53 = vadd.f32 %v1360_v4, %v655_v45  ;;  %v1026_v54 = vunpack.c.h.bf16 %v1248_v34  ;;  %v116_v55 = vmul.f32 %v1355_v3, %v1025_v46 }
  0x65   :  { %v367_v56 = vadd.f32 %v335_v47, %v175_v28  ;;  %v368_v57 = vadd.f32 %v336_v48, %v176_v36  ;;  %v528_v58 = vmax.f32 %v496_v49, 0.0  ;;  %v688_v59 = vadd.f32 %v1360_v4, %v656_v50 }
  0x66   :  { %v719_v61 = vmax.f32 %v687_v53, 0.0  ;;  %v117_v62 = vmul.f32 %v1355_v3, %v1026_v54  ;;  %v151_v63 = vadd.f32 %v1360_v4, %v116_v55  ;;  %v1089_v0 = vunpack.c.l.bf16 %v1263_v51 }
  0x67   :  { %v559_v1 = vadd.f32 %v527_v52, %v367_v56  ;;  %v560_v2 = vadd.f32 %v528_v58, %v368_v57  ;;  %v720_v5 = vmax.f32 %v688_v59, 0.0  ;;  %v1090_v6 = vunpack.c.h.bf16 %v1263_v51  ;;  %v1297_v51 = vld [vmem:[%s1967_s6 + $0x70] sm:$0xff]   ;;  %v1241_v56 = vld [vmem:[%s1964_s3 + $0x18] sm:$0xff]  }
  0x68   :  { %v152_v8 = vadd.f32 %v1360_v4, %v117_v62  ;;  %v183_v9 = vmax.f32 %v151_v63, 0.0  ;;  %v279_v10 = vmul.f32 %v1355_v3, %v1089_v0  ;;  %v1153_v11 = vunpack.c.l.bf16 %v1278_v60 }
  0x69   :  { %v751_v12 = vadd.f32 %v719_v61, %v559_v1  ;;  %v752_v13 = vadd.f32 %v720_v5, %v560_v2  ;;  %v280_v14 = vmul.f32 %v1355_v3, %v1090_v6  ;;  %v1154_v15 = vunpack.c.h.bf16 %v1278_v60  ;;  %v1704_v5 = vld [vmem:[%s1962_s0] ss:$0 sm:$0xff] }
  0x6a   :  { %v184_v17 = vmax.f32 %v152_v8, 0.0  ;;  %v311_v18 = vadd.f32 %v1360_v4, %v279_v10  ;;  %v471_v19 = vmul.f32 %v1355_v3, %v1153_v11  ;;  %v1217_v20 = vunpack.c.l.bf16 %v1293_v7 }
  0x6b   :  { %v777_v21 = vpack.c.bf16 %v752_v13, %v751_v12  ;;  %v312_v22 = vadd.f32 %v1360_v4, %v280_v14  ;;  %v472_v23 = vmul.f32 %v1355_v3, %v1154_v15  ;;  %v1218_v24 = vunpack.c.h.bf16 %v1293_v7  ;;  %v1256_v15 = vld [vmem:[%s1965_s4 + $0x18] sm:$0xff]  }
  0x6c   :  { %v343_v25 = vmax.f32 %v311_v18, 0.0  ;;  %v503_v26 = vadd.f32 %v1360_v4, %v471_v19  ;;  %v663_v27 = vmul.f32 %v1355_v3, %v1217_v20  ;;  %v1041_v28 = vunpack.c.l.bf16 %v1252_v16 }
  0x6d   :  { %973 = vmatmul.msk.bf16.gmra.mxu1 %vm788_vm1, %v777_v21  ;;  %v344_v29 = vmax.f32 %v312_v22, 0.0  ;;  %v504_v30 = vadd.f32 %v1360_v4, %v472_v23  ;;  %v664_v31 = vmul.f32 %v1355_v3, %v1218_v24  ;;  %v1042_v32 = vunpack.c.h.bf16 %v1252_v16  ;;  %v1271_v24 = vld [vmem:[%s1966_s5 + $0x18] sm:$0xff]  }
  0x6e   :  { %v375_v34 = vadd.f32 %v343_v25, %v183_v9  ;;  %v535_v35 = vmax.f32 %v503_v26, 0.0  ;;  %v695_v36 = vadd.f32 %v1360_v4, %v663_v27  ;;  %v124_v37 = vmul.f32 %v1355_v3, %v1041_v28  ;;  %v1710_v9 = vld [vmem:[%s1963_s1] ss:$0 sm:$0xff] }
  0x6f   :  { %v376_v38 = vadd.f32 %v344_v29, %v184_v17  ;;  %v536_v39 = vmax.f32 %v504_v30, 0.0  ;;  %v696_v40 = vadd.f32 %v1360_v4, %v664_v31  ;;  %v125_v41 = vmul.f32 %v1355_v3, %v1042_v32  ;;  %v1286_v29 = vld [vmem:[%s1967_s6 + $0x18] sm:$0xff]  }
  0x70   :  { %v567_v43 = vadd.f32 %v535_v35, %v375_v34  ;;  %v727_v44 = vmax.f32 %v695_v36, 0.0  ;;  %v159_v45 = vadd.f32 %v1360_v4, %v124_v37  ;;  %v1105_v46 = vunpack.c.l.bf16 %v1267_v33 }
  0x71   :  { %v568_v47 = vadd.f32 %v536_v39, %v376_v38  ;;  %v728_v48 = vmax.f32 %v696_v40, 0.0  ;;  %v160_v49 = vadd.f32 %v1360_v4, %v125_v41  ;;  %v1106_v50 = vunpack.c.h.bf16 %v1267_v33  ;;  %v1245_v38 = vld [vmem:[%s1964_s3 + $0x38] sm:$0xff]  }
  0x72   :  { %v759_v52 = vadd.f32 %v727_v44, %v567_v43  ;;  %v191_v53 = vmax.f32 %v159_v45, 0.0  ;;  %v287_v54 = vmul.f32 %v1355_v3, %v1105_v46  ;;  %v1169_v55 = vunpack.c.l.bf16 %v1282_v42 }
  0x73   :  { %v760_v57 = vadd.f32 %v728_v48, %v568_v47  ;;  %v192_v58 = vmax.f32 %v160_v49, 0.0  ;;  %v288_v59 = vmul.f32 %v1355_v3, %v1106_v50  ;;  %v1170_v60 = vunpack.c.h.bf16 %v1282_v42 }
  0x74   :  { %v319_v61 = vadd.f32 %v1360_v4, %v287_v54  ;;  %v479_v62 = vmul.f32 %v1355_v3, %v1169_v55  ;;  %v1233_v63 = vunpack.c.l.bf16 %v1297_v51  ;;  %v1234_v0 = vunpack.c.h.bf16 %v1297_v51 }
  0x75   :  { %v781_v1 = vpack.c.bf16 %v760_v57, %v759_v52  ;;  %v320_v2 = vadd.f32 %v1360_v4, %v288_v59  ;;  %v480_v6 = vmul.f32 %v1704_v5, %v1170_v60  ;;  %v997_v7 = vunpack.c.l.bf16 %v1241_v56  ;;  %v1260_v59 = vld [vmem:[%s1965_s4 + $0x38] sm:$0xff]  }
  0x76   :  { %v351_v8 = vmax.f32 %v319_v61, 0.0  ;;  %v511_v3 = vadd.f32 %v1710_v9, %v479_v62  ;;  %v671_v10 = vmul.f32 %v1704_v5, %v1233_v63  ;;  %v672_v4 = vmul.f32 %v1704_v5, %v1234_v0  ;;  %v1275_v0 = vld [vmem:[%s1966_s5 + $0x38] sm:$0xff]  }
  0x77   :  { %977 = vmatmul.msk.bf16.gmra.mxu2 %vm788_vm1, %v781_v1  ;;  %v352_v11 = vmax.f32 %v320_v2, 0.0  ;;  %v512_v12 = vadd.f32 %v1710_v9, %v480_v6  ;;  %v998_v13 = vunpack.c.h.bf16 %v1241_v56  ;;  %v102_v14 = vmul.f32 %v1704_v5, %v997_v7 }
  0x78   :  { %v383_v16 = vadd.f32 %v351_v8, %v191_v53  ;;  %v543_v17 = vmax.f32 %v511_v3, 0.0  ;;  %v703_v18 = vadd.f32 %v1710_v9, %v671_v10  ;;  %v704_v19 = vadd.f32 %v1710_v9, %v672_v4 }
  0x79   :  { %v384_v20 = vadd.f32 %v352_v11, %v192_v58  ;;  %v544_v21 = vmax.f32 %v512_v12, 0.0  ;;  %v103_v22 = vmul.f32 %v1704_v5, %v998_v13  ;;  %v137_v23 = vadd.f32 %v1710_v9, %v102_v14  ;;  %v1290_v11 = vld [vmem:[%s1967_s6 + $0x38] sm:$0xff]  }
  0x7a   :  { %v575_v25 = vadd.f32 %v543_v17, %v383_v16  ;;  %v735_v26 = vmax.f32 %v703_v18, 0.0  ;;  %v736_v27 = vmax.f32 %v704_v19, 0.0  ;;  %v1061_v28 = vunpack.c.l.bf16 %v1256_v15 }
  0x7b   :  { %v576_v30 = vadd.f32 %v544_v21, %v384_v20  ;;  %v138_v31 = vadd.f32 %v1710_v9, %v103_v22  ;;  %v169_v32 = vmax.f32 %v137_v23, 0.0  ;;  %v1062_v33 = vunpack.c.h.bf16 %v1256_v15  ;;  %v1249_v20 = vld [vmem:[%s1964_s3 + $0x58] sm:$0xff]  }
  0x7c   :  { %v767_v34 = vadd.f32 %v735_v26, %v575_v25  ;;  %v265_v35 = vmul.f32 %v1704_v5, %v1061_v28  ;;  %v1125_v36 = vunpack.c.l.bf16 %v1271_v24  ;;  %v1126_v37 = vunpack.c.h.bf16 %v1271_v24 }
  0x7d   :  { %v768_v39 = vadd.f32 %v736_v27, %v576_v30  ;;  %v170_v40 = vmax.f32 %v138_v31, 0.0  ;;  %v266_v41 = vmul.f32 %v1704_v5, %v1062_v33  ;;  %v1189_v42 = vunpack.c.l.bf16 %v1286_v29 }
  0x7e   :  { %v297_v43 = vadd.f32 %v1710_v9, %v265_v35  ;;  %v457_v44 = vmul.f32 %v1704_v5, %v1125_v36  ;;  %v458_v45 = vmul.f32 %v1704_v5, %v1126_v37  ;;  %v1190_v46 = vunpack.c.h.bf16 %v1286_v29  ;;  %v1264_v37 = vld [vmem:[%s1965_s4 + $0x58] sm:$0xff]  }
  0x7f   :  { %v785_v47 = vpack.c.bf16 %v768_v39, %v767_v34  ;;  %v298_v48 = vadd.f32 %v1710_v9, %v266_v41  ;;  %v649_v49 = vmul.f32 %v1704_v5, %v1189_v42  ;;  %v1013_v50 = vunpack.c.l.bf16 %v1245_v38 }
  0x80   :  { %v329_v51 = vmax.f32 %v297_v43, 0.0  ;;  %v489_v52 = vadd.f32 %v1710_v9, %v457_v44  ;;  %v490_v53 = vadd.f32 %v1710_v9, %v458_v45  ;;  %v650_v54 = vmul.f32 %v1704_v5, %v1190_v46  ;;  %v1279_v46 = vld [vmem:[%s1966_s5 + $0x58] sm:$0xff]  }
  0x81   :  { %981 = vmatmul.msk.bf16.gmra.mxu3 %vm788_vm1, %v785_v47  ;;  %v330_v55 = vmax.f32 %v298_v48, 0.0  ;;  %v681_v56 = vadd.f32 %v1710_v9, %v649_v49  ;;  %v1014_v57 = vunpack.c.h.bf16 %v1245_v38  ;;  %v110_v58 = vmul.f32 %v1704_v5, %v1013_v50 }
  0x82   :  { %v361_v60 = vadd.f32 %v329_v51, %v169_v32  ;;  %v521_v61 = vmax.f32 %v489_v52, 0.0  ;;  %v522_v62 = vmax.f32 %v490_v53, 0.0  ;;  %v682_v63 = vadd.f32 %v1710_v9, %v650_v54 }
  0x83   :  { %v362_v1 = vadd.f32 %v330_v55, %v170_v40  ;;  %v713_v2 = vmax.f32 %v681_v56, 0.0  ;;  %v111_v6 = vmul.f32 %v1704_v5, %v1014_v57  ;;  %v145_v7 = vadd.f32 %v1710_v9, %v110_v58  ;;  %v1294_v55 = vld [vmem:[%s1967_s6 + $0x58] sm:$0xff]  }
  0x84   :  { %v553_v8 = vadd.f32 %v521_v61, %v361_v60  ;;  %v714_v3 = vmax.f32 %v682_v63, 0.0  ;;  %v1077_v10 = vunpack.c.l.bf16 %v1260_v59  ;;  %v1078_v4 = vunpack.c.h.bf16 %v1260_v59 }
  0x85   :  { %v554_v12 = vadd.f32 %v522_v62, %v362_v1  ;;  %v146_v13 = vadd.f32 %v1710_v9, %v111_v6  ;;  %v177_v14 = vmax.f32 %v145_v7, 0.0  ;;  %v1141_v15 = vunpack.c.l.bf16 %v1275_v0 }
  0x86   :  { %v745_v16 = vadd.f32 %v713_v2, %v553_v8  ;;  %v273_v17 = vmul.f32 %v1704_v5, %v1077_v10  ;;  %v274_v18 = vmul.f32 %v1704_v5, %v1078_v4  ;;  %v1142_v19 = vunpack.c.h.bf16 %v1275_v0  ;;  %v1253_v0 = vld [vmem:[%s1964_s3 + $0x78] sm:$0xff]  }
  0x87   :  { %v746_v21 = vadd.f32 %v714_v3, %v554_v12  ;;  %v178_v22 = vmax.f32 %v146_v13, 0.0  ;;  %v465_v23 = vmul.f32 %v1704_v5, %v1141_v15  ;;  %v1205_v24 = vunpack.c.l.bf16 %v1290_v11 }
  0x88   :  { %v305_v25 = vadd.f32 %v1710_v9, %v273_v17  ;;  %v306_v26 = vadd.f32 %v1710_v9, %v274_v18  ;;  %v466_v27 = vmul.f32 %v1704_v5, %v1142_v19  ;;  %v1206_v28 = vunpack.c.h.bf16 %v1290_v11 }
  0x89   :  { %v774_v29 = vpack.c.bf16 %v746_v21, %v745_v16  ;;  %v497_v30 = vadd.f32 %v1710_v9, %v465_v23  ;;  %v657_v31 = vmul.f32 %v1704_v5, %v1205_v24  ;;  %v1029_v32 = vunpack.c.l.bf16 %v1249_v20 }
  0x8a   :  { %v337_v33 = vmax.f32 %v305_v25, 0.0  ;;  %v338_v34 = vmax.f32 %v306_v26, 0.0  ;;  %v498_v35 = vadd.f32 %v1710_v9, %v466_v27  ;;  %v658_v36 = vmul.f32 %v1704_v5, %v1206_v28 }
  0x8b   :  { %970 = vmatmul.msk.bf16.gmra.mxu0 %vm788_vm1, %v774_v29  ;;  %v529_v38 = vmax.f32 %v497_v30, 0.0  ;;  %v689_v39 = vadd.f32 %v1710_v9, %v657_v31  ;;  %v1030_v40 = vunpack.c.h.bf16 %v1249_v20  ;;  %v118_v41 = vmul.f32 %v1704_v5, %v1029_v32  ;;  %v1268_v20 = vld [vmem:[%s1965_s4 + $0x78] sm:$0xff]  }
  0x8c   :  { %v369_v42 = vadd.f32 %v337_v33, %v177_v14  ;;  %v370_v43 = vadd.f32 %v338_v34, %v178_v22  ;;  %v530_v44 = vmax.f32 %v498_v35, 0.0  ;;  %v690_v45 = vadd.f32 %v1710_v9, %v658_v36  ;;  %v1283_v29 = vld [vmem:[%s1966_s5 + $0x78] sm:$0xff]  }
  0x8d   :  { %v721_v47 = vmax.f32 %v689_v39, 0.0  ;;  %v119_v48 = vmul.f32 %v1704_v5, %v1030_v40  ;;  %v153_v49 = vadd.f32 %v1710_v9, %v118_v41  ;;  %v1093_v50 = vunpack.c.l.bf16 %v1264_v37 }
  0x8e   :  { %v561_v51 = vadd.f32 %v529_v38, %v369_v42  ;;  %v562_v52 = vadd.f32 %v530_v44, %v370_v43  ;;  %v722_v53 = vmax.f32 %v690_v45, 0.0  ;;  %v1094_v54 = vunpack.c.h.bf16 %v1264_v37  ;;  %v1298_v38 = vld [vmem:[%s1967_s6 + $0x78] sm:$0xff]  }
  0x8f   :  { %v154_v56 = vadd.f32 %v1710_v9, %v119_v48  ;;  %v185_v57 = vmax.f32 %v153_v49, 0.0  ;;  %v281_v58 = vmul.f32 %v1704_v5, %v1093_v50  ;;  %v1157_v59 = vunpack.c.l.bf16 %v1279_v46 }
  0x90   :  { %v753_v60 = vadd.f32 %v721_v47, %v561_v51  ;;  %v754_v61 = vadd.f32 %v722_v53, %v562_v52  ;;  %v282_v62 = vmul.f32 %v1704_v5, %v1094_v54  ;;  %v1158_v63 = vunpack.c.h.bf16 %v1279_v46 }
  0x91   :  { %v186_v1 = vmax.f32 %v154_v56, 0.0  ;;  %v313_v2 = vadd.f32 %v1710_v9, %v281_v58  ;;  %v473_v6 = vmul.f32 %v1704_v5, %v1157_v59  ;;  %v1221_v7 = vunpack.c.l.bf16 %v1294_v55 }
  0x92   :  { %v778_v8 = vpack.c.bf16 %v754_v61, %v753_v60  ;;  %v314_v3 = vadd.f32 %v1710_v9, %v282_v62  ;;  %v474_v10 = vmul.f32 %v1704_v5, %v1158_v63  ;;  %v1222_v4 = vunpack.c.h.bf16 %v1294_v55 }
  0x93   :  { %v345_v11 = vmax.f32 %v313_v2, 0.0  ;;  %v505_v12 = vadd.f32 %v1710_v9, %v473_v6  ;;  %v665_v13 = vmul.f32 %v1704_v5, %v1221_v7  ;;  %v1045_v14 = vunpack.c.l.bf16 %v1253_v0  ;;  %v850_v15 = vpop.f32.mrf.mxu0 }
  0x94   :  { %974 = vmatmul.msk.bf16.gmra.mxu1 %vm788_vm1, %v778_v8  ;;  %v346_v16 = vmax.f32 %v314_v3, 0.0  ;;  %v506_v17 = vadd.f32 %v1710_v9, %v474_v10  ;;  %v666_v18 = vmul.f32 %v1704_v5, %v1222_v4  ;;  %v1046_v19 = vunpack.c.h.bf16 %v1253_v0  ;;  %931 = vst.msk [vmem:[%s1968_s7] sm:$0xff] %vm930_vm2, %v850_v15 }
  0x95   :  { %v377_v21 = vadd.f32 %v345_v11, %v185_v57  ;;  %v537_v22 = vmax.f32 %v505_v12, 0.0  ;;  %v697_v23 = vadd.f32 %v1710_v9, %v665_v13  ;;  %v126_v24 = vmul.f32 %v1704_v5, %v1045_v14 }
  0x96   :  { %v378_v25 = vadd.f32 %v346_v16, %v186_v1  ;;  %v538_v26 = vmax.f32 %v506_v17, 0.0  ;;  %v698_v27 = vadd.f32 %v1710_v9, %v666_v18  ;;  %v127_v28 = vmul.f32 %v1704_v5, %v1046_v19 }
  0x97   :  { %v569_v30 = vadd.f32 %v537_v22, %v377_v21  ;;  %v729_v31 = vmax.f32 %v697_v23, 0.0  ;;  %v161_v32 = vadd.f32 %v1710_v9, %v126_v24  ;;  %v1109_v33 = vunpack.c.l.bf16 %v1268_v20 }
  0x98   :  { %v570_v34 = vadd.f32 %v538_v26, %v378_v25  ;;  %v730_v35 = vmax.f32 %v698_v27, 0.0  ;;  %v162_v36 = vadd.f32 %v1710_v9, %v127_v28  ;;  %v1110_v37 = vunpack.c.h.bf16 %v1268_v20 }
  0x99   :  { %v761_v39 = vadd.f32 %v729_v31, %v569_v30  ;;  %v193_v40 = vmax.f32 %v161_v32, 0.0  ;;  %v289_v41 = vmul.f32 %v1704_v5, %v1109_v33  ;;  %v1173_v42 = vunpack.c.l.bf16 %v1283_v29 }
  0x9a   :  { %v762_v43 = vadd.f32 %v730_v35, %v570_v34  ;;  %v194_v44 = vmax.f32 %v162_v36, 0.0  ;;  %v290_v45 = vmul.f32 %v1704_v5, %v1110_v37  ;;  %v1174_v46 = vunpack.c.h.bf16 %v1283_v29 }
  0x9b   :  { %v321_v47 = vadd.f32 %v1710_v9, %v289_v41  ;;  %v481_v48 = vmul.f32 %v1704_v5, %v1173_v42  ;;  %v1237_v49 = vunpack.c.l.bf16 %v1298_v38  ;;  %v1238_v50 = vunpack.c.h.bf16 %v1298_v38  ;;  %v852_v51 = vpop.f32.mrf.mxu0 }
  0x9c   :  { %v782_v52 = vpack.c.bf16 %v762_v43, %v761_v39  ;;  %v322_v53 = vadd.f32 %v1710_v9, %v290_v45  ;;  %v482_v54 = vmul.f32 %v1704_v5, %v1174_v46  ;;  %932 = vst.msk [vmem:[%s1968_s7 + $0x8] sm:$0xff] %vm930_vm2, %v852_v51 }
  0x9d   :  { %v353_v55 = vmax.f32 %v321_v47, 0.0  ;;  %v513_v56 = vadd.f32 %v1710_v9, %v481_v48  ;;  %v673_v57 = vmul.f32 %v1704_v5, %v1237_v49  ;;  %v674_v58 = vmul.f32 %v1704_v5, %v1238_v50 }
  0x9e   :  { %978 = vmatmul.msk.bf16.gmra.mxu2 %vm788_vm1, %v782_v52  ;;  %v354_v59 = vmax.f32 %v322_v53, 0.0  ;;  %v514_v60 = vadd.f32 %v1710_v9, %v482_v54  ;;  %v870_v61 = vpop.f32.mrf.mxu1 }
  0x9f   :  { %v385_v62 = vadd.f32 %v353_v55, %v193_v40  ;;  %v545_v63 = vmax.f32 %v513_v56, 0.0  ;;  %v705_v5 = vadd.f32 %v1710_v9, %v673_v57  ;;  %v706_v0 = vadd.f32 %v1710_v9, %v674_v58  ;;  %939 = vst.msk [vmem:[%s1968_s7 + $0x40] sm:$0xff] %vm930_vm2, %v870_v61 }
  0xa0   :  { %v386_v1 = vadd.f32 %v354_v59, %v194_v44  ;;  %v546_v2 = vmax.f32 %v514_v60, 0.0 }
  0xa1   :  { %v577_v6 = vadd.f32 %v545_v63, %v385_v62  ;;  %v737_v7 = vmax.f32 %v705_v5, 0.0  ;;  %v738_v8 = vmax.f32 %v706_v0, 0.0 }
  0xa2   :  { %v578_v3 = vadd.f32 %v546_v2, %v386_v1 }
  0xa3   :  { %v769_v10 = vadd.f32 %v737_v7, %v577_v6 }
  0xa4   :  { %v770_v4 = vadd.f32 %v738_v8, %v578_v3 }
  0xa6   :  { %v786_v11 = vpack.c.bf16 %v770_v4, %v769_v10  ;;  %v872_v12 = vpop.f32.mrf.mxu1 }
  0xa7   :  { %940 = vst.msk [vmem:[%s1968_s7 + $0x48] sm:$0xff] %vm930_vm2, %v872_v12 }
  0xa8   :  { %982 = vmatmul.msk.bf16.gmra.mxu3 %vm788_vm1, %v786_v11 }
  0xad   :  { %v890_v9 = vpop.f32.mrf.mxu2 }
  0xae   :  { %947 = vst.msk [vmem:[%s1968_s7 + $0x80] sm:$0xff] %vm930_vm2, %v890_v9 }
  0xb5   :  { %v892_v13 = vpop.f32.mrf.mxu2 }
  0xb6   :  { %v910_v14 = vpop.f32.mrf.mxu3  ;;  %948 = vst.msk [vmem:[%s1968_s7 + $0x88] sm:$0xff] %vm930_vm2, %v892_v13 }
  0xb7   :  { %955 = vst.msk [vmem:[%s1968_s7 + $0xc0] sm:$0xff] %vm930_vm2, %v910_v14 }
  0xba   :  { %v855_v15 = vpop.f32.mrf.mxu0 }
  0xbb   :  { %933 = vst.msk [vmem:[%s1968_s7 + $0x10] sm:$0xff] %vm930_vm2, %v855_v15 }
  0xbe   :  { %v912_v16 = vpop.f32.mrf.mxu3 }
  0xbf   :  { %956 = vst.msk [vmem:[%s1968_s7 + $0xc8] sm:$0xff] %vm930_vm2, %v912_v16 }
  0xc2   :  { %v857_v17 = vpop.f32.mrf.mxu0 }
  0xc3   :  { %v875_v18 = vpop.f32.mrf.mxu1  ;;  %934 = vst.msk [vmem:[%s1968_s7 + $0x18] sm:$0xff] %vm930_vm2, %v857_v17 }
  0xc4   :  { %941 = vst.msk [vmem:[%s1968_s7 + $0x50] sm:$0xff] %vm930_vm2, %v875_v18 }
  0xcb   :  { %v877_v19 = vpop.f32.mrf.mxu1 }
  0xcc   :  { %942 = vst.msk [vmem:[%s1968_s7 + $0x58] sm:$0xff] %vm930_vm2, %v877_v19 }
  0xd3   :  { %v895_v20 = vpop.f32.mrf.mxu2 }
  0xd4   :  { %949 = vst.msk [vmem:[%s1968_s7 + $0x90] sm:$0xff] %vm930_vm2, %v895_v20 }
  0xdb   :  { %v897_v21 = vpop.f32.mrf.mxu2 }
  0xdc   :  { %950 = vst.msk [vmem:[%s1968_s7 + $0x98] sm:$0xff] %vm930_vm2, %v897_v21 }
  0xdd   :  { %v915_v22 = vpop.f32.mrf.mxu3 }
  0xde   :  { %957 = vst.msk [vmem:[%s1968_s7 + $0xd0] sm:$0xff] %vm930_vm2, %v915_v22 }
  0xe1   :  { %v860_v23 = vpop.f32.mrf.mxu0 }
  0xe2   :  { %935 = vst.msk [vmem:[%s1968_s7 + $0x20] sm:$0xff] %vm930_vm2, %v860_v23 }
  0xe5   :  { %v917_v24 = vpop.f32.mrf.mxu3 }
  0xe6   :  { %958 = vst.msk [vmem:[%s1968_s7 + $0xd8] sm:$0xff] %vm930_vm2, %v917_v24 }
  0xe9   :  { %v862_v25 = vpop.f32.mrf.mxu0 }
  0xea   :  { %v880_v26 = vpop.f32.mrf.mxu1  ;;  %936 = vst.msk [vmem:[%s1968_s7 + $0x28] sm:$0xff] %vm930_vm2, %v862_v25 }
  0xeb   :  { %943 = vst.msk [vmem:[%s1968_s7 + $0x60] sm:$0xff] %vm930_vm2, %v880_v26 }
  0xf2   :  { %v882_v27 = vpop.f32.mrf.mxu1 }
  0xf3   :  { %944 = vst.msk [vmem:[%s1968_s7 + $0x68] sm:$0xff] %vm930_vm2, %v882_v27 }
  0xfa   :  { %v900_v28 = vpop.f32.mrf.mxu2 }
  0xfb   :  { %951 = vst.msk [vmem:[%s1968_s7 + $0xa0] sm:$0xff] %vm930_vm2, %v900_v28 }
 0x102   :  { %v902_v29 = vpop.f32.mrf.mxu2 }
 0x103   :  { %952 = vst.msk [vmem:[%s1968_s7 + $0xa8] sm:$0xff] %vm930_vm2, %v902_v29 }
 0x104   :  { %v920_v30 = vpop.f32.mrf.mxu3 }
 0x105   :  { %959 = vst.msk [vmem:[%s1968_s7 + $0xe0] sm:$0xff] %vm930_vm2, %v920_v30 }
 0x108   :  { %v865_v31 = vpop.f32.mrf.mxu0 }
 0x109   :  { %937 = vst.msk [vmem:[%s1968_s7 + $0x30] sm:$0xff] %vm930_vm2, %v865_v31 }
 0x10c   :  { %v922_v32 = vpop.f32.mrf.mxu3 }
 0x10d   :  { %960 = vst.msk [vmem:[%s1968_s7 + $0xe8] sm:$0xff] %vm930_vm2, %v922_v32 }
 0x110   :  { %v867_v33 = vpop.f32.mrf.mxu0 }
 0x111   :  { %v885_v34 = vpop.f32.mrf.mxu1  ;;  %938 = vst.msk [vmem:[%s1968_s7 + $0x38] sm:$0xff] %vm930_vm2, %v867_v33 }
 0x112   :  { %945 = vst.msk [vmem:[%s1968_s7 + $0x70] sm:$0xff] %vm930_vm2, %v885_v34 }
 0x119   :  { %v887_v35 = vpop.f32.mrf.mxu1 }
 0x11a   :  { %946 = vst.msk [vmem:[%s1968_s7 + $0x78] sm:$0xff] %vm930_vm2, %v887_v35 }
 0x121   :  { %v905_v36 = vpop.f32.mrf.mxu2 }
 0x122   :  { %953 = vst.msk [vmem:[%s1968_s7 + $0xb0] sm:$0xff] %vm930_vm2, %v905_v36 }
 0x129   :  { %v907_v37 = vpop.f32.mrf.mxu2 }
 0x12a   :  { %954 = vst.msk [vmem:[%s1968_s7 + $0xb8] sm:$0xff] %vm930_vm2, %v907_v37 }
 0x12b   :  { %v925_v38 = vpop.f32.mrf.mxu3 }
 0x12c   :  { %961 = vst.msk [vmem:[%s1968_s7 + $0xf0] sm:$0xff] %vm930_vm2, %v925_v38 }
 0x133   :  { %v927_v39 = vpop.f32.mrf.mxu3 }
 0x134   :  { %962 = vst.msk [vmem:[%s1968_s7 + $0xf8] sm:$0xff] %vm930_vm2, %v927_v39 }

</bundles_post_ra>
